<compile_context>
chip_gen: v5e
topology: v5e:2x2
jax: 0.10.0
libtpu: 0.0.40
codegen_flags: <defaults>
</compile_context>

<pallas_src>
import math
import functools

import jax
import jax.numpy as jnp
import numpy as np
from jax.experimental import pallas as pl
from jax.experimental.pallas import tpu as pltpu

EPS = 1e-5  # nn.LayerNorm default


def _layer_norm(y, gamma, beta):
    """LayerNorm over the last dim, all in f32."""
    mu = jnp.mean(y, axis=-1, keepdims=True)
    var = jnp.mean((y - mu) ** 2, axis=-1, keepdims=True)
    return (y - mu) * jax.lax.rsqrt(var + EPS) * gamma + beta


def transformer_block_kernel(
    x_ref,      # [Bb, S, E]   activations block
    wqt_ref,    # [E, H*E]     pre-transposed, 1/sqrt(E) folded in
    wkt_ref,    # [E, H*E]
    wvt_ref,    # [E, H*E]
    wct_ref,    # [H*E, E]
    w1t_ref,    # [E, 4E]
    w2t_ref,    # [4E, E]
    slab_ref,   # [8, 4E]      packed LN/bias vectors (f32)
    o_ref,      # [Bb, S, E]
    head_acc_ref,  # [Bb*S, H*E] VMEM scratch, compute dtype
    *, num_heads, compute_dtype,
):
    Bb, S, E = x_ref.shape
    M = Bb * S

    # Unpack the LN/bias slab (one tiny load, static slices).
    slab = slab_ref[...]
    g1 = slab[0:1, :E]
    b1 = slab[1:2, :E]
    bw1 = slab[2:3, :]        # [1, 4E]
    bw2 = slab[3:4, :E]
    g2 = slab[4:5, :E]
    b2 = slab[5:6, :E]

    x = x_ref[...]                                   # [Bb, S, E]
    x_rows = x.reshape(M, E)                         # [M, E]
    xm = x_rows.astype(compute_dtype)                # MXU input dtype

    # Q/K/V projections: one big matmul each, pre-transposed weights.
    q = jnp.dot(xm, wqt_ref[...], preferred_element_type=jnp.float32)   # [M, H*E] (scaled)
    k = jnp.dot(xm, wkt_ref[...], preferred_element_type=jnp.float32)
    v = jnp.dot(xm, wvt_ref[...], preferred_element_type=jnp.float32)

    # Cast once on full 128-lane tiles (not per 32-lane head slice).
    qc = q.astype(compute_dtype).reshape(Bb, S, num_heads * E)
    kc = k.astype(compute_dtype).reshape(Bb, S, num_heads * E)
    vc = v.astype(compute_dtype).reshape(Bb, S, num_heads * E)

    # Per-head attention; each head's output is written straight into the
    # [M, H*E] scratch at its lane offset (no list / no lane concat).
    for h in range(num_heads):
        sl = slice(h * E, (h + 1) * E)
        qh = qc[:, :, sl]
        kh = kc[:, :, sl]
        vh = vc[:, :, sl]

        s = jnp.einsum("bqe,bke->bqk", qh, kh,
                       preferred_element_type=jnp.float32)              # [Bb, S, S]
        s = s - jnp.max(s, axis=-1, keepdims=True)
        p = jnp.exp(s)                                                   # in [0, 1]
        denom = jnp.sum(p, axis=-1, keepdims=True)                       # [Bb, S, 1]
        # EUP approximate reciprocal + one Newton step on the tiny column.
        r = pl.reciprocal(denom, approx=True)
        r = r * (2.0 - denom * r)

        # Deferred softmax normalization: scale the small [Bb,S,E] output,
        # not the [Bb,S,S] score tile.
        oh = jnp.einsum("bqk,bke->bqe", p.astype(compute_dtype), vh,
                        preferred_element_type=jnp.float32)              # [Bb, S, E]
        oh = oh * r
        head_acc_ref[:, sl] = oh.reshape(M, E).astype(head_acc_ref.dtype)

    # Single output projection over the concatenated-head scratch (K = H*E).
    attn = jnp.dot(head_acc_ref[...], wct_ref[...],
                   preferred_element_type=jnp.float32)                   # [M, E]

    # Residual + LayerNorm 1 (f32)
    normed1 = _layer_norm(attn + x_rows.astype(jnp.float32), g1, b1)     # [M, E]

    # Feed-forward: E -> 4E -> E with ReLU; biases added in f32.
    h1 = jnp.dot(normed1.astype(compute_dtype), w1t_ref[...],
                 preferred_element_type=jnp.float32) + bw1
    h1 = jnp.maximum(h1, 0.0)
    h2 = jnp.dot(h1.astype(compute_dtype), w2t_ref[...],
                 preferred_element_type=jnp.float32) + bw2

    # Residual + LayerNorm 2 — single fused store of the final result.
    out = _layer_norm(h2 + normed1, g2, b2)
    o_ref[...] = out.reshape(Bb, S, E).astype(o_ref.dtype)


def _vmem_capacity_bytes():
    try:
        return int(pltpu.get_tpu_info().vmem_capacity_bytes)
    except Exception:
        return 64 * 1024 * 1024  # conservative: v7x per-TensorCore VMEM


def transformer_block(x, params, *, compute_dtype=jnp.bfloat16, target_rows=256):
    """x: [B, S, E]. params: PyTorch-layout weights (W[out, in]); transposed here."""
    B, S, E = x.shape
    HE = params["wq"].shape[0]
    H = HE // E
    # NOTE: in this module head_dim == embed_size == E, so 1/sqrt(E) is the
    # correct attention scale; fold it into Wq once.
    scale = 1.0 / math.sqrt(E)

    # One-time layout prep (host/XLA): transpose to [in, out], fold attention
    # scale into Wq, cast big matrices to the MXU compute dtype.
    wqt = (params["wq"].T * scale).astype(compute_dtype)   # [E, H*E]
    wkt = params["wk"].T.astype(compute_dtype)             # [E, H*E]
    wvt = params["wv"].T.astype(compute_dtype)             # [E, H*E]
    wct = params["wc"].T.astype(compute_dtype)             # [H*E, E]
    w1t = params["w1"].T.astype(compute_dtype)             # [E, 4E]
    w2t = params["w2"].T.astype(compute_dtype)             # [4E, E]

    # Pack the six tiny LN/bias vectors into one [8, 4E] f32 slab.
    C = 4 * E
    slab = jnp.zeros((8, C), jnp.float32)
    slab = slab.at[0, :E].set(params["g1"].reshape(-1).astype(jnp.float32))
    slab = slab.at[1, :E].set(params["b1"].reshape(-1).astype(jnp.float32))
    slab = slab.at[2, :].set(params["bw1"].reshape(-1).astype(jnp.float32))
    slab = slab.at[3, :E].set(params["bw2"].reshape(-1).astype(jnp.float32))
    slab = slab.at[4, :E].set(params["g2"].reshape(-1).astype(jnp.float32))
    slab = slab.at[5, :E].set(params["b2"].reshape(-1).astype(jnp.float32))

    # Block-size selection: scale the activation block with available VMEM
    # (v5e/v6e have 128 MiB per core, v7x 64 MiB), but always leave >= 2 grid
    # steps when B > 1 so the "parallel" axis can use both v7x TensorCores.
    vmem_cap = _vmem_capacity_bytes()
    if vmem_cap >= 96 * 1024 * 1024:
        target_rows *= 2
    b_blk = min(B, max(1, target_rows // max(S, 1)))
    if B > 1:
        b_blk = min(b_blk, B // 2)
    while B % b_blk:
        b_blk -= 1
    grid = (B // b_blk,)

    # VMEM footprint: weights/slab single-buffered, x/out blocks double-buffered,
    # plus the head-output scratch.  Cap well below physical VMEM (48 MiB / 75%).
    def nbytes(a):
        return int(a.size) * a.dtype.itemsize
    weight_bytes = sum(nbytes(w) for w in (wqt, wkt, wvt, wct, w1t, w2t, slab))
    io_bytes = 2 * 2 * (b_blk * S * E * x.dtype.itemsize)      # x + out, double-buffered
    scratch_bytes = b_blk * S * H * E * jnp.dtype(compute_dtype).itemsize
    footprint = weight_bytes + io_bytes + scratch_bytes
    vmem_limit = max(16 * 1024 * 1024, 2 * footprint)
    vmem_limit = int(min(vmem_limit, 48 * 1024 * 1024, (vmem_cap * 3) // 4))

    def const_spec(shape):
        nd = len(shape)
        # Grid-invariant block: constant index map + single pipeline buffer.
        return pl.BlockSpec(shape, lambda g, _nd=nd: (0,) * _nd,
                            pipeline_mode=pl.Buffered(1))

    kernel = functools.partial(
        transformer_block_kernel, num_heads=H, compute_dtype=compute_dtype)

    return pl.pallas_call(
        kernel,
        out_shape=jax.ShapeDtypeStruct((B, S, E), x.dtype),
        grid=grid,
        in_specs=[
            pl.BlockSpec((b_blk, S, E), lambda g: (g, 0, 0)),   # x block (pipelined)
            const_spec(wqt.shape), const_spec(wkt.shape),
            const_spec(wvt.shape), const_spec(wct.shape),
            const_spec(w1t.shape), const_spec(w2t.shape),
            const_spec(slab.shape),
        ],
        out_specs=pl.BlockSpec((b_blk, S, E), lambda g: (g, 0, 0)),
        scratch_shapes=[pltpu.VMEM((b_blk * S, H * E), compute_dtype)],
        compiler_params=pltpu.CompilerParams(
            dimension_semantics=("parallel",),
            vmem_limit_bytes=vmem_limit),
    )(x, wqt, wkt, wvt, wct, w1t, w2t, slab)


# ---------------- pure-JAX reference (mirrors the PyTorch forward) ----------------
def reference_forward(x, p):
    B, S, E = x.shape
    H = p["wq"].shape[0] // E
    q = (x @ p["wq"].T).reshape(B, S, H, E).transpose(0, 2, 1, 3)   # [B,H,S,E]
    k = (x @ p["wk"].T).reshape(B, S, H, E).transpose(0, 2, 1, 3)
    v = (x @ p["wv"].T).reshape(B, S, H, E).transpose(0, 2, 1, 3)
    dot = jnp.einsum("bhqe,bhke->bhqk", q, k) / math.sqrt(E)
    dot = jax.nn.softmax(dot, axis=-1)
    o = jnp.einsum("bhqk,bhke->bhqe", dot, v).transpose(0, 2, 1, 3).reshape(B, S, H * E)
    attn = o @ p["wc"].T

    def ln(y, g, b):
        mu = jnp.mean(y, axis=-1, keepdims=True)
        var = jnp.mean((y - mu) ** 2, axis=-1, keepdims=True)
        return (y - mu) / jnp.sqrt(var + EPS) * g + b

    n1 = ln(attn + x, p["g1"][0], p["b1"][0])
    h = jax.nn.relu(n1 @ p["w1"].T + p["bw1"][0])
    h = h @ p["w2"].T + p["bw2"][0]
    return ln(h + n1, p["g2"][0], p["b2"][0])


if __name__ == "__main__":
    B, S, E, H = 2, 8, 32, 4
    key = jax.random.PRNGKey(0)
    keys = jax.random.split(key, 12)

    def w(k, shape, fan_in):
        bound = 1.0 / math.sqrt(fan_in)
        return jax.random.uniform(k, shape, jnp.float32, -bound, bound)

    params = {
        "wq": w(keys[0], (H * E, E), E),
        "wk": w(keys[1], (H * E, E), E),
        "wv": w(keys[2], (H * E, E), E),
        "wc": w(keys[3], (E, H * E), H * E),
        "g1": jnp.ones((1, E), jnp.float32),
        "b1": jnp.zeros((1, E), jnp.float32),
        "w1": w(keys[4], (4 * E, E), E),
        "bw1": w(keys[5], (1, 4 * E), E),
        "w2": w(keys[6], (E, 4 * E), 4 * E),
        "bw2": w(keys[7], (1, E), 4 * E),
        "g2": jnp.ones((1, E), jnp.float32),
        "b2": jnp.zeros((1, E), jnp.float32),
    }

    x = jax.random.normal(keys[8], (B, S, E), jnp.float32)
    ref = reference_forward(x, params)

    # f32 compute path (tight check; approx-reciprocal error removed by Newton step).
    out_f32 = jax.block_until_ready(transformer_block(x, params,
                                                      compute_dtype=jnp.float32))
    np.testing.assert_allclose(np.asarray(out_f32), np.asarray(ref),
                               rtol=5e-4, atol=5e-4)

    # bf16 MXU path (default; f32 accumulation / statistics) — loose sanity check.
    out_bf16 = jax.block_until_ready(transformer_block(x, params))
    np.testing.assert_allclose(np.asarray(out_bf16), np.asarray(ref),
                               rtol=1e-1, atol=1e-1)

    print("KERNEL_OK")
</pallas_src>

<mosaic_0001>
module attributes {stable_mosaic.version = 11 : i64} {
  func.func @transformer_block_kernel(%arg0: i32, %arg1: memref<1x8x32xf32, #tpu.memory_space<vmem>>, %arg2: memref<32x128xf32, #tpu.memory_space<vmem>>, %arg3: memref<32x128xf32, #tpu.memory_space<vmem>>, %arg4: memref<32x128xf32, #tpu.memory_space<vmem>>, %arg5: memref<128x32xf32, #tpu.memory_space<vmem>>, %arg6: memref<32x128xf32, #tpu.memory_space<vmem>>, %arg7: memref<128x32xf32, #tpu.memory_space<vmem>>, %arg8: memref<8x128xf32, #tpu.memory_space<vmem>>, %arg9: memref<1x8x32xf32, #tpu.memory_space<vmem>>, %arg10: memref<8x128xf32, #tpu.memory_space<vmem>>) attributes {dimension_semantics = [#tpu.dimension_semantics<parallel>], iteration_bounds = array<i64: 2>, scalar_prefetch = 0 : i64, scratch_operands = 1 : i64, tpu.core_type = #tpu.core_type<tc>, window_params = [{transform_indices = @transform_0, window_bounds = array<i64: 1, 8, 32>}, {pipeline_mode = #tpu.pipeline_mode<synchronous>, transform_indices = @transform_1, window_bounds = array<i64: 32, 128>}, {pipeline_mode = #tpu.pipeline_mode<synchronous>, transform_indices = @transform_2, window_bounds = array<i64: 32, 128>}, {pipeline_mode = #tpu.pipeline_mode<synchronous>, transform_indices = @transform_3, window_bounds = array<i64: 32, 128>}, {pipeline_mode = #tpu.pipeline_mode<synchronous>, transform_indices = @transform_4, window_bounds = array<i64: 128, 32>}, {pipeline_mode = #tpu.pipeline_mode<synchronous>, transform_indices = @transform_5, window_bounds = array<i64: 32, 128>}, {pipeline_mode = #tpu.pipeline_mode<synchronous>, transform_indices = @transform_6, window_bounds = array<i64: 128, 32>}, {pipeline_mode = #tpu.pipeline_mode<synchronous>, transform_indices = @transform_7, window_bounds = array<i64: 8, 128>}, {transform_indices = @transform_8, window_bounds = array<i64: 1, 8, 32>}]} {
    %c0 = arith.constant 0 : index
    %c0_0 = arith.constant 0 : index
    %0 = vector.load %arg8[%c0, %c0_0] : memref<8x128xf32, #tpu.memory_space<vmem>>, vector<8x128xf32>
    %1 = vector.extract_strided_slice %0 {offsets = [0, 0], sizes = [1, 32], strides = [1, 1]} : vector<8x128xf32> to vector<1x32xf32>
    %2 = vector.extract_strided_slice %0 {offsets = [1, 0], sizes = [1, 32], strides = [1, 1]} : vector<8x128xf32> to vector<1x32xf32>
    %3 = vector.extract_strided_slice %0 {offsets = [2, 0], sizes = [1, 128], strides = [1, 1]} : vector<8x128xf32> to vector<1x128xf32>
    %4 = vector.extract_strided_slice %0 {offsets = [3, 0], sizes = [1, 32], strides = [1, 1]} : vector<8x128xf32> to vector<1x32xf32>
    %5 = vector.extract_strided_slice %0 {offsets = [4, 0], sizes = [1, 32], strides = [1, 1]} : vector<8x128xf32> to vector<1x32xf32>
    %6 = vector.extract_strided_slice %0 {offsets = [5, 0], sizes = [1, 32], strides = [1, 1]} : vector<8x128xf32> to vector<1x32xf32>
    %c0_1 = arith.constant 0 : index
    %c0_2 = arith.constant 0 : index
    %c0_3 = arith.constant 0 : index
    %7 = vector.load %arg1[%c0_1, %c0_2, %c0_3] : memref<1x8x32xf32, #tpu.memory_space<vmem>>, vector<1x8x32xf32>
    %8 = vector.shape_cast %7 : vector<1x8x32xf32> to vector<8x32xf32>
    %c0_4 = arith.constant 0 : index
    %c0_5 = arith.constant 0 : index
    %9 = vector.load %arg2[%c0_4, %c0_5] : memref<32x128xf32, #tpu.memory_space<vmem>>, vector<32x128xf32>
    %cst = arith.constant dense<0.000000e+00> : vector<8x128xf32>
    %10 = tpu.matmul %8, %9, %cst {dimension_numbers = #tpu.dot_dimension_numbers<[1], [0], [0], [1], [0, 0, 1, 1], [], []>} : vector<8x32xf32>, vector<32x128xf32>, vector<8x128xf32> -> vector<8x128xf32>
    %c0_6 = arith.constant 0 : index
    %c0_7 = arith.constant 0 : index
    %11 = vector.load %arg3[%c0_6, %c0_7] : memref<32x128xf32, #tpu.memory_space<vmem>>, vector<32x128xf32>
    %cst_8 = arith.constant dense<0.000000e+00> : vector<8x128xf32>
    %12 = tpu.matmul %8, %11, %cst_8 {dimension_numbers = #tpu.dot_dimension_numbers<[1], [0], [0], [1], [0, 0, 1, 1], [], []>} : vector<8x32xf32>, vector<32x128xf32>, vector<8x128xf32> -> vector<8x128xf32>
    %c0_9 = arith.constant 0 : index
    %c0_10 = arith.constant 0 : index
    %13 = vector.load %arg4[%c0_9, %c0_10] : memref<32x128xf32, #tpu.memory_space<vmem>>, vector<32x128xf32>
    %cst_11 = arith.constant dense<0.000000e+00> : vector<8x128xf32>
    %14 = tpu.matmul %8, %13, %cst_11 {dimension_numbers = #tpu.dot_dimension_numbers<[1], [0], [0], [1], [0, 0, 1, 1], [], []>} : vector<8x32xf32>, vector<32x128xf32>, vector<8x128xf32> -> vector<8x128xf32>
    %15 = vector.shape_cast %10 : vector<8x128xf32> to vector<1x8x128xf32>
    %16 = vector.shape_cast %12 : vector<8x128xf32> to vector<1x8x128xf32>
    %17 = vector.shape_cast %14 : vector<8x128xf32> to vector<1x8x128xf32>
    %18 = vector.extract_strided_slice %15 {offsets = [0, 0, 0], sizes = [1, 8, 32], strides = [1, 1, 1]} : vector<1x8x128xf32> to vector<1x8x32xf32>
    %19 = vector.extract_strided_slice %16 {offsets = [0, 0, 0], sizes = [1, 8, 32], strides = [1, 1, 1]} : vector<1x8x128xf32> to vector<1x8x32xf32>
    %20 = vector.extract_strided_slice %17 {offsets = [0, 0, 0], sizes = [1, 8, 32], strides = [1, 1, 1]} : vector<1x8x128xf32> to vector<1x8x32xf32>
    "tpu.trace_start"() <{level = 10 : i32, message = "bqe,bke->bqk"}> : () -> ()
    %cst_12 = arith.constant dense<0.000000e+00> : vector<1x8x8xf32>
    %21 = tpu.matmul %18, %19, %cst_12 {dimension_numbers = #tpu.dot_dimension_numbers<[2], [2], [1], [1], [0, 0, 0, 1, 1, 1], [0], [0]>} : vector<1x8x32xf32>, vector<1x8x32xf32>, vector<1x8x8xf32> -> vector<1x8x8xf32>
    "tpu.trace_stop"() : () -> ()
    %cst_13 = arith.constant dense<0xFF800000> : vector<1x8xf32>
    %22 = vector.multi_reduction <maximumf>, %21, %cst_13 [2] : vector<1x8x8xf32> to vector<1x8xf32>
    %23 = vector.shape_cast %22 : vector<1x8xf32> to vector<1x8x1xf32>
    %24 = vector.broadcast %23 : vector<1x8x1xf32> to vector<1x8x8xf32>
    %25 = arith.subf %21, %24 : vector<1x8x8xf32>
    %26 = math.exp %25 : vector<1x8x8xf32>
    %cst_14 = arith.constant dense<0.000000e+00> : vector<1x8xf32>
    %27 = vector.multi_reduction <add>, %26, %cst_14 [2] : vector<1x8x8xf32> to vector<1x8xf32>
    %28 = vector.shape_cast %27 : vector<1x8xf32> to vector<1x8x1xf32>
    %29 = tpu.reciprocal %28 {approx = true} : vector<1x8x1xf32> -> vector<1x8x1xf32>
    %30 = arith.mulf %28, %29 : vector<1x8x1xf32>
    %cst_15 = arith.constant 2.000000e+00 : f32
    %31 = vector.broadcast %cst_15 : f32 to vector<1x8x1xf32>
    %32 = arith.subf %31, %30 : vector<1x8x1xf32>
    %33 = arith.mulf %29, %32 : vector<1x8x1xf32>
    "tpu.trace_start"() <{level = 10 : i32, message = "bqk,bke->bqe"}> : () -> ()
    %cst_16 = arith.constant dense<0.000000e+00> : vector<1x8x32xf32>
    %34 = tpu.matmul %26, %20, %cst_16 {dimension_numbers = #tpu.dot_dimension_numbers<[2], [1], [1], [2], [0, 0, 0, 1, 1, 2], [0], [0]>} : vector<1x8x8xf32>, vector<1x8x32xf32>, vector<1x8x32xf32> -> vector<1x8x32xf32>
    "tpu.trace_stop"() : () -> ()
    %35 = vector.broadcast %33 : vector<1x8x1xf32> to vector<1x8x32xf32>
    %36 = arith.mulf %34, %35 : vector<1x8x32xf32>
    %37 = vector.shape_cast %36 : vector<1x8x32xf32> to vector<8x32xf32>
    %c0_17 = arith.constant 0 : index
    %c0_18 = arith.constant 0 : index
    %38 = vector.load %arg10[%c0_17, %c0_18] : memref<8x128xf32, #tpu.memory_space<vmem>>, vector<8x32xf32>
    tpu.vector_store %arg10[%c0_17, %c0_18], %37 {strides = array<i32>} : memref<8x128xf32, #tpu.memory_space<vmem>>, vector<8x32xf32>,
    %39 = vector.extract_strided_slice %15 {offsets = [0, 0, 32], sizes = [1, 8, 32], strides = [1, 1, 1]} : vector<1x8x128xf32> to vector<1x8x32xf32>
    %40 = vector.extract_strided_slice %16 {offsets = [0, 0, 32], sizes = [1, 8, 32], strides = [1, 1, 1]} : vector<1x8x128xf32> to vector<1x8x32xf32>
    %41 = vector.extract_strided_slice %17 {offsets = [0, 0, 32], sizes = [1, 8, 32], strides = [1, 1, 1]} : vector<1x8x128xf32> to vector<1x8x32xf32>
    "tpu.trace_start"() <{level = 10 : i32, message = "bqe,bke->bqk"}> : () -> ()
    %cst_19 = arith.constant dense<0.000000e+00> : vector<1x8x8xf32>
    %42 = tpu.matmul %39, %40, %cst_19 {dimension_numbers = #tpu.dot_dimension_numbers<[2], [2], [1], [1], [0, 0, 0, 1, 1, 1], [0], [0]>} : vector<1x8x32xf32>, vector<1x8x32xf32>, vector<1x8x8xf32> -> vector<1x8x8xf32>
    "tpu.trace_stop"() : () -> ()
    %cst_20 = arith.constant dense<0xFF800000> : vector<1x8xf32>
    %43 = vector.multi_reduction <maximumf>, %42, %cst_20 [2] : vector<1x8x8xf32> to vector<1x8xf32>
    %44 = vector.shape_cast %43 : vector<1x8xf32> to vector<1x8x1xf32>
    %45 = vector.broadcast %44 : vector<1x8x1xf32> to vector<1x8x8xf32>
    %46 = arith.subf %42, %45 : vector<1x8x8xf32>
    %47 = math.exp %46 : vector<1x8x8xf32>
    %cst_21 = arith.constant dense<0.000000e+00> : vector<1x8xf32>
    %48 = vector.multi_reduction <add>, %47, %cst_21 [2] : vector<1x8x8xf32> to vector<1x8xf32>
    %49 = vector.shape_cast %48 : vector<1x8xf32> to vector<1x8x1xf32>
    %50 = tpu.reciprocal %49 {approx = true} : vector<1x8x1xf32> -> vector<1x8x1xf32>
    %51 = arith.mulf %49, %50 : vector<1x8x1xf32>
    %cst_22 = arith.constant 2.000000e+00 : f32
    %52 = vector.broadcast %cst_22 : f32 to vector<1x8x1xf32>
    %53 = arith.subf %52, %51 : vector<1x8x1xf32>
    %54 = arith.mulf %50, %53 : vector<1x8x1xf32>
    "tpu.trace_start"() <{level = 10 : i32, message = "bqk,bke->bqe"}> : () -> ()
    %cst_23 = arith.constant dense<0.000000e+00> : vector<1x8x32xf32>
    %55 = tpu.matmul %47, %41, %cst_23 {dimension_numbers = #tpu.dot_dimension_numbers<[2], [1], [1], [2], [0, 0, 0, 1, 1, 2], [0], [0]>} : vector<1x8x8xf32>, vector<1x8x32xf32>, vector<1x8x32xf32> -> vector<1x8x32xf32>
    "tpu.trace_stop"() : () -> ()
    %56 = vector.broadcast %54 : vector<1x8x1xf32> to vector<1x8x32xf32>
    %57 = arith.mulf %55, %56 : vector<1x8x32xf32>
    %58 = vector.shape_cast %57 : vector<1x8x32xf32> to vector<8x32xf32>
    %c0_24 = arith.constant 0 : index
    %c32 = arith.constant 32 : index
    %59 = vector.load %arg10[%c0_24, %c32] : memref<8x128xf32, #tpu.memory_space<vmem>>, vector<8x32xf32>
    tpu.vector_store %arg10[%c0_24, %c32], %58 {strides = array<i32>} : memref<8x128xf32, #tpu.memory_space<vmem>>, vector<8x32xf32>,
    %60 = vector.extract_strided_slice %15 {offsets = [0, 0, 64], sizes = [1, 8, 32], strides = [1, 1, 1]} : vector<1x8x128xf32> to vector<1x8x32xf32>
    %61 = vector.extract_strided_slice %16 {offsets = [0, 0, 64], sizes = [1, 8, 32], strides = [1, 1, 1]} : vector<1x8x128xf32> to vector<1x8x32xf32>
    %62 = vector.extract_strided_slice %17 {offsets = [0, 0, 64], sizes = [1, 8, 32], strides = [1, 1, 1]} : vector<1x8x128xf32> to vector<1x8x32xf32>
    "tpu.trace_start"() <{level = 10 : i32, message = "bqe,bke->bqk"}> : () -> ()
    %cst_25 = arith.constant dense<0.000000e+00> : vector<1x8x8xf32>
    %63 = tpu.matmul %60, %61, %cst_25 {dimension_numbers = #tpu.dot_dimension_numbers<[2], [2], [1], [1], [0, 0, 0, 1, 1, 1], [0], [0]>} : vector<1x8x32xf32>, vector<1x8x32xf32>, vector<1x8x8xf32> -> vector<1x8x8xf32>
    "tpu.trace_stop"() : () -> ()
    %cst_26 = arith.constant dense<0xFF800000> : vector<1x8xf32>
    %64 = vector.multi_reduction <maximumf>, %63, %cst_26 [2] : vector<1x8x8xf32> to vector<1x8xf32>
    %65 = vector.shape_cast %64 : vector<1x8xf32> to vector<1x8x1xf32>
    %66 = vector.broadcast %65 : vector<1x8x1xf32> to vector<1x8x8xf32>
    %67 = arith.subf %63, %66 : vector<1x8x8xf32>
    %68 = math.exp %67 : vector<1x8x8xf32>
    %cst_27 = arith.constant dense<0.000000e+00> : vector<1x8xf32>
    %69 = vector.multi_reduction <add>, %68, %cst_27 [2] : vector<1x8x8xf32> to vector<1x8xf32>
    %70 = vector.shape_cast %69 : vector<1x8xf32> to vector<1x8x1xf32>
    %71 = tpu.reciprocal %70 {approx = true} : vector<1x8x1xf32> -> vector<1x8x1xf32>
    %72 = arith.mulf %70, %71 : vector<1x8x1xf32>
    %cst_28 = arith.constant 2.000000e+00 : f32
    %73 = vector.broadcast %cst_28 : f32 to vector<1x8x1xf32>
    %74 = arith.subf %73, %72 : vector<1x8x1xf32>
    %75 = arith.mulf %71, %74 : vector<1x8x1xf32>
    "tpu.trace_start"() <{level = 10 : i32, message = "bqk,bke->bqe"}> : () -> ()
    %cst_29 = arith.constant dense<0.000000e+00> : vector<1x8x32xf32>
    %76 = tpu.matmul %68, %62, %cst_29 {dimension_numbers = #tpu.dot_dimension_numbers<[2], [1], [1], [2], [0, 0, 0, 1, 1, 2], [0], [0]>} : vector<1x8x8xf32>, vector<1x8x32xf32>, vector<1x8x32xf32> -> vector<1x8x32xf32>
    "tpu.trace_stop"() : () -> ()
    %77 = vector.broadcast %75 : vector<1x8x1xf32> to vector<1x8x32xf32>
    %78 = arith.mulf %76, %77 : vector<1x8x32xf32>
    %79 = vector.shape_cast %78 : vector<1x8x32xf32> to vector<8x32xf32>
    %c0_30 = arith.constant 0 : index
    %c64 = arith.constant 64 : index
    %80 = vector.load %arg10[%c0_30, %c64] : memref<8x128xf32, #tpu.memory_space<vmem>>, vector<8x32xf32>
    tpu.vector_store %arg10[%c0_30, %c64], %79 {strides = array<i32>} : memref<8x128xf32, #tpu.memory_space<vmem>>, vector<8x32xf32>,
    %81 = vector.extract_strided_slice %15 {offsets = [0, 0, 96], sizes = [1, 8, 32], strides = [1, 1, 1]} : vector<1x8x128xf32> to vector<1x8x32xf32>
    %82 = vector.extract_strided_slice %16 {offsets = [0, 0, 96], sizes = [1, 8, 32], strides = [1, 1, 1]} : vector<1x8x128xf32> to vector<1x8x32xf32>
    %83 = vector.extract_strided_slice %17 {offsets = [0, 0, 96], sizes = [1, 8, 32], strides = [1, 1, 1]} : vector<1x8x128xf32> to vector<1x8x32xf32>
    "tpu.trace_start"() <{level = 10 : i32, message = "bqe,bke->bqk"}> : () -> ()
    %cst_31 = arith.constant dense<0.000000e+00> : vector<1x8x8xf32>
    %84 = tpu.matmul %81, %82, %cst_31 {dimension_numbers = #tpu.dot_dimension_numbers<[2], [2], [1], [1], [0, 0, 0, 1, 1, 1], [0], [0]>} : vector<1x8x32xf32>, vector<1x8x32xf32>, vector<1x8x8xf32> -> vector<1x8x8xf32>
    "tpu.trace_stop"() : () -> ()
    %cst_32 = arith.constant dense<0xFF800000> : vector<1x8xf32>
    %85 = vector.multi_reduction <maximumf>, %84, %cst_32 [2] : vector<1x8x8xf32> to vector<1x8xf32>
    %86 = vector.shape_cast %85 : vector<1x8xf32> to vector<1x8x1xf32>
    %87 = vector.broadcast %86 : vector<1x8x1xf32> to vector<1x8x8xf32>
    %88 = arith.subf %84, %87 : vector<1x8x8xf32>
    %89 = math.exp %88 : vector<1x8x8xf32>
    %cst_33 = arith.constant dense<0.000000e+00> : vector<1x8xf32>
    %90 = vector.multi_reduction <add>, %89, %cst_33 [2] : vector<1x8x8xf32> to vector<1x8xf32>
    %91 = vector.shape_cast %90 : vector<1x8xf32> to vector<1x8x1xf32>
    %92 = tpu.reciprocal %91 {approx = true} : vector<1x8x1xf32> -> vector<1x8x1xf32>
    %93 = arith.mulf %91, %92 : vector<1x8x1xf32>
    %cst_34 = arith.constant 2.000000e+00 : f32
    %94 = vector.broadcast %cst_34 : f32 to vector<1x8x1xf32>
    %95 = arith.subf %94, %93 : vector<1x8x1xf32>
    %96 = arith.mulf %92, %95 : vector<1x8x1xf32>
    "tpu.trace_start"() <{level = 10 : i32, message = "bqk,bke->bqe"}> : () -> ()
    %cst_35 = arith.constant dense<0.000000e+00> : vector<1x8x32xf32>
    %97 = tpu.matmul %89, %83, %cst_35 {dimension_numbers = #tpu.dot_dimension_numbers<[2], [1], [1], [2], [0, 0, 0, 1, 1, 2], [0], [0]>} : vector<1x8x8xf32>, vector<1x8x32xf32>, vector<1x8x32xf32> -> vector<1x8x32xf32>
    "tpu.trace_stop"() : () -> ()
    %98 = vector.broadcast %96 : vector<1x8x1xf32> to vector<1x8x32xf32>
    %99 = arith.mulf %97, %98 : vector<1x8x32xf32>
    %100 = vector.shape_cast %99 : vector<1x8x32xf32> to vector<8x32xf32>
    %c0_36 = arith.constant 0 : index
    %c96 = arith.constant 96 : index
    %101 = vector.load %arg10[%c0_36, %c96] : memref<8x128xf32, #tpu.memory_space<vmem>>, vector<8x32xf32>
    tpu.vector_store %arg10[%c0_36, %c96], %100 {strides = array<i32>} : memref<8x128xf32, #tpu.memory_space<vmem>>, vector<8x32xf32>,
    %c0_37 = arith.constant 0 : index
    %c0_38 = arith.constant 0 : index
    %102 = vector.load %arg10[%c0_37, %c0_38] : memref<8x128xf32, #tpu.memory_space<vmem>>, vector<8x128xf32>
    %c0_39 = arith.constant 0 : index
    %c0_40 = arith.constant 0 : index
    %103 = vector.load %arg5[%c0_39, %c0_40] : memref<128x32xf32, #tpu.memory_space<vmem>>, vector<128x32xf32>
    %cst_41 = arith.constant dense<0.000000e+00> : vector<8x32xf32>
    %104 = tpu.matmul %102, %103, %cst_41 {dimension_numbers = #tpu.dot_dimension_numbers<[1], [0], [0], [1], [0, 0, 1, 1], [], []>} : vector<8x128xf32>, vector<128x32xf32>, vector<8x32xf32> -> vector<8x32xf32>
    %105 = arith.addf %104, %8 : vector<8x32xf32>
    %cst_42 = arith.constant dense<0.000000e+00> : vector<8xf32>
    %106 = vector.multi_reduction <add>, %105, %cst_42 [1] : vector<8x32xf32> to vector<8xf32>
    %107 = vector.shape_cast %106 : vector<8xf32> to vector<8x1xf32>
    %cst_43 = arith.constant 3.200000e+01 : f32
    %108 = vector.broadcast %cst_43 : f32 to vector<8x1xf32>
    %109 = arith.divf %107, %108 : vector<8x1xf32>
    %110 = vector.broadcast %109 : vector<8x1xf32> to vector<8x32xf32>
    %111 = arith.subf %105, %110 : vector<8x32xf32>
    %112 = arith.mulf %111, %111 : vector<8x32xf32>
    %cst_44 = arith.constant dense<0.000000e+00> : vector<8xf32>
    %113 = vector.multi_reduction <add>, %112, %cst_44 [1] : vector<8x32xf32> to vector<8xf32>
    %114 = vector.shape_cast %113 : vector<8xf32> to vector<8x1xf32>
    %cst_45 = arith.constant 3.200000e+01 : f32
    %115 = vector.broadcast %cst_45 : f32 to vector<8x1xf32>
    %116 = arith.divf %114, %115 : vector<8x1xf32>
    %117 = vector.broadcast %109 : vector<8x1xf32> to vector<8x32xf32>
    %118 = arith.subf %105, %117 : vector<8x32xf32>
    %cst_46 = arith.constant 9.99999974E-6 : f32
    %119 = vector.broadcast %cst_46 : f32 to vector<8x1xf32>
    %120 = arith.addf %116, %119 : vector<8x1xf32>
    %121 = math.rsqrt %120 : vector<8x1xf32>
    %122 = vector.broadcast %121 : vector<8x1xf32> to vector<8x32xf32>
    %123 = arith.mulf %118, %122 : vector<8x32xf32>
    %124 = vector.broadcast %1 : vector<1x32xf32> to vector<8x32xf32>
    %125 = arith.mulf %123, %124 : vector<8x32xf32>
    %126 = vector.broadcast %2 : vector<1x32xf32> to vector<8x32xf32>
    %127 = arith.addf %125, %126 : vector<8x32xf32>
    %c0_47 = arith.constant 0 : index
    %c0_48 = arith.constant 0 : index
    %128 = vector.load %arg6[%c0_47, %c0_48] : memref<32x128xf32, #tpu.memory_space<vmem>>, vector<32x128xf32>
    %cst_49 = arith.constant dense<0.000000e+00> : vector<8x128xf32>
    %129 = tpu.matmul %127, %128, %cst_49 {dimension_numbers = #tpu.dot_dimension_numbers<[1], [0], [0], [1], [0, 0, 1, 1], [], []>} : vector<8x32xf32>, vector<32x128xf32>, vector<8x128xf32> -> vector<8x128xf32>
    %130 = vector.broadcast %3 : vector<1x128xf32> to vector<8x128xf32>
    %131 = arith.addf %129, %130 : vector<8x128xf32>
    %cst_50 = arith.constant 0.000000e+00 : f32
    %132 = vector.broadcast %cst_50 : f32 to vector<8x128xf32>
    %133 = arith.maximumf %131, %132 : vector<8x128xf32>
    %c0_51 = arith.constant 0 : index
    %c0_52 = arith.constant 0 : index
    %134 = vector.load %arg7[%c0_51, %c0_52] : memref<128x32xf32, #tpu.memory_space<vmem>>, vector<128x32xf32>
    %cst_53 = arith.constant dense<0.000000e+00> : vector<8x32xf32>
    %135 = tpu.matmul %133, %134, %cst_53 {dimension_numbers = #tpu.dot_dimension_numbers<[1], [0], [0], [1], [0, 0, 1, 1], [], []>} : vector<8x128xf32>, vector<128x32xf32>, vector<8x32xf32> -> vector<8x32xf32>
    %136 = vector.broadcast %4 : vector<1x32xf32> to vector<8x32xf32>
    %137 = arith.addf %135, %136 : vector<8x32xf32>
    %138 = arith.addf %137, %127 : vector<8x32xf32>
    %cst_54 = arith.constant dense<0.000000e+00> : vector<8xf32>
    %139 = vector.multi_reduction <add>, %138, %cst_54 [1] : vector<8x32xf32> to vector<8xf32>
    %140 = vector.shape_cast %139 : vector<8xf32> to vector<8x1xf32>
    %cst_55 = arith.constant 3.200000e+01 : f32
    %141 = vector.broadcast %cst_55 : f32 to vector<8x1xf32>
    %142 = arith.divf %140, %141 : vector<8x1xf32>
    %143 = vector.broadcast %142 : vector<8x1xf32> to vector<8x32xf32>
    %144 = arith.subf %138, %143 : vector<8x32xf32>
    %145 = arith.mulf %144, %144 : vector<8x32xf32>
    %cst_56 = arith.constant dense<0.000000e+00> : vector<8xf32>
    %146 = vector.multi_reduction <add>, %145, %cst_56 [1] : vector<8x32xf32> to vector<8xf32>
    %147 = vector.shape_cast %146 : vector<8xf32> to vector<8x1xf32>
    %cst_57 = arith.constant 3.200000e+01 : f32
    %148 = vector.broadcast %cst_57 : f32 to vector<8x1xf32>
    %149 = arith.divf %147, %148 : vector<8x1xf32>
    %150 = vector.broadcast %142 : vector<8x1xf32> to vector<8x32xf32>
    %151 = arith.subf %138, %150 : vector<8x32xf32>
    %cst_58 = arith.constant 9.99999974E-6 : f32
    %152 = vector.broadcast %cst_58 : f32 to vector<8x1xf32>
    %153 = arith.addf %149, %152 : vector<8x1xf32>
    %154 = math.rsqrt %153 : vector<8x1xf32>
    %155 = vector.broadcast %154 : vector<8x1xf32> to vector<8x32xf32>
    %156 = arith.mulf %151, %155 : vector<8x32xf32>
    %157 = vector.broadcast %5 : vector<1x32xf32> to vector<8x32xf32>
    %158 = arith.mulf %156, %157 : vector<8x32xf32>
    %159 = vector.broadcast %6 : vector<1x32xf32> to vector<8x32xf32>
    %160 = arith.addf %158, %159 : vector<8x32xf32>
    %161 = vector.shape_cast %160 : vector<8x32xf32> to vector<1x8x32xf32>
    %c0_59 = arith.constant 0 : index
    %c0_60 = arith.constant 0 : index
    %c0_61 = arith.constant 0 : index
    %162 = vector.load %arg9[%c0_59, %c0_60, %c0_61] : memref<1x8x32xf32, #tpu.memory_space<vmem>>, vector<1x8x32xf32>
    tpu.vector_store %arg9[%c0_59, %c0_60, %c0_61], %161 {strides = array<i32>} : memref<1x8x32xf32, #tpu.memory_space<vmem>>, vector<1x8x32xf32>,
    return
  }
  func.func @transform_0(%arg0: i32) -> (i32, i32, i32) {
    %c0_i32 = arith.constant 0 : i32
    %c0_i32_0 = arith.constant 0 : i32
    %c0_i32_1 = arith.constant 0 : i32
    return %arg0, %c0_i32, %c0_i32_0 : i32, i32, i32
  }
  func.func @transform_1(%arg0: i32) -> (i32, i32) {
    %c0_i32 = arith.constant 0 : i32
    %c0_i32_0 = arith.constant 0 : i32
    %c0_i32_1 = arith.constant 0 : i32
    return %c0_i32, %c0_i32_0 : i32, i32
  }
  func.func @transform_2(%arg0: i32) -> (i32, i32) {
    %c0_i32 = arith.constant 0 : i32
    %c0_i32_0 = arith.constant 0 : i32
    %c0_i32_1 = arith.constant 0 : i32
    return %c0_i32, %c0_i32_0 : i32, i32
  }
  func.func @transform_3(%arg0: i32) -> (i32, i32) {
    %c0_i32 = arith.constant 0 : i32
    %c0_i32_0 = arith.constant 0 : i32
    %c0_i32_1 = arith.constant 0 : i32
    return %c0_i32, %c0_i32_0 : i32, i32
  }
  func.func @transform_4(%arg0: i32) -> (i32, i32) {
    %c0_i32 = arith.constant 0 : i32
    %c0_i32_0 = arith.constant 0 : i32
    %c0_i32_1 = arith.constant 0 : i32
    return %c0_i32, %c0_i32_0 : i32, i32
  }
  func.func @transform_5(%arg0: i32) -> (i32, i32) {
    %c0_i32 = arith.constant 0 : i32
    %c0_i32_0 = arith.constant 0 : i32
    %c0_i32_1 = arith.constant 0 : i32
    return %c0_i32, %c0_i32_0 : i32, i32
  }
  func.func @transform_6(%arg0: i32) -> (i32, i32) {
    %c0_i32 = arith.constant 0 : i32
    %c0_i32_0 = arith.constant 0 : i32
    %c0_i32_1 = arith.constant 0 : i32
    return %c0_i32, %c0_i32_0 : i32, i32
  }
  func.func @transform_7(%arg0: i32) -> (i32, i32) {
    %c0_i32 = arith.constant 0 : i32
    %c0_i32_0 = arith.constant 0 : i32
    %c0_i32_1 = arith.constant 0 : i32
    return %c0_i32, %c0_i32_0 : i32, i32
  }
  func.func @transform_8(%arg0: i32) -> (i32, i32, i32) {
    %c0_i32 = arith.constant 0 : i32
    %c0_i32_0 = arith.constant 0 : i32
    %c0_i32_1 = arith.constant 0 : i32
    return %arg0, %c0_i32, %c0_i32_0 : i32, i32, i32
  }
}

</mosaic_0001>

<bundles_post_ra>
// kernel: tpu_custom_call.1
= control target key start
LH: loop header
LB: loop body
LE: loop exit
PB: predicated region body
PF: predicated region fallthrough
CT: control target
= control target key end

     0   :  { %13 = vsyncpa [#allocation4], 0  ;;  %s1404_s0 = inlined_call_operand.vmem [shape: f32[2,8,32], index: 0, kind: input, shape index: {}]   ;;  %s1405_s1 = inlined_call_operand.vmem [shape: f32[32,128], index: 1, kind: input, shape index: {}]   ;;  %s1406_s2 = inlined_call_operand.vmem [shape: f32[32,128], index: 2, kind: input, shape index: {}]   ;;  %s1407_s3 = inlined_call_operand.vmem [shape: f32[32,128], index: 3, kind: input, shape index: {}]   ;;  %s1408_s4 = inlined_call_operand.vmem [shape: f32[128,32], index: 4, kind: input, shape index: {}]   ;;  %s1409_s5 = inlined_call_operand.vmem [shape: f32[32,128], index: 5, kind: input, shape index: {}]   ;;  %s1410_s6 = inlined_call_operand.vmem [shape: f32[128,32], index: 6, kind: input, shape index: {}]   ;;  %s1411_s7 = inlined_call_operand.vmem [shape: f32[8,128], index: 7, kind: input, shape index: {}]   ;;  %s1412_s8 = inlined_call_operand.hbm [shape: f32[2,8,32], index: 8, kind: output, shape index: {}]  }
   0x1   :  { %15 = vsyncpa [#allocation4 + $0x1], 0  ;;  %s1110_s27 = smov 0   ;;  %s1112_s28 = smov 0  }
   0x2   :  { %s1114_s29 = smov 0   ;;  %s1116_s30 = smov 0  }
   0x3 LB: > { %s1131_s9 = sadd.s32 4294967295, %s1059_s30   ;;  %s906_s10 = sadd.s32 4294967294, %s1059_s30   ;;  %s1059_s30 = sphi %s1116_s30, %s1418_s30   ;;  %s1055_s29 = sphi %s1114_s29, %s1417_s29   ;;  %s1051_s28 = sphi %s1112_s28, %s1416_s28   ;;  %s1047_s27 = sphi %s1110_s27, %s1415_s27  }
   0x4   : > { %s1135_s11 = sadd.s32 1, %s1059_s30   ;;  %s201_s12 = sadd.s32 1, %s1055_s29 }
   0x5   : > { %s198_s13 = ssub.s32 %s1059_s30, %s1135_s11  ;;  %p211_p0 = scmp.ne.s32.totalorder %s1055_s29, %s1051_s28 }
   0x6   : > { %p199_p1 = scmp.eq.s32.totalorder %s198_s13, 0  ;;  %p212_p2 = scmp.eq.s32.totalorder %s1131_s9, 1 }
   0x7   : > { %p217_p3 = scmp.ne.s32.totalorder %s1051_s28, %s1047_s27  ;;  %p218_p4 = scmp.eq.s32.totalorder %s906_s10, 1 }
   0x8   : > { %s1146_s14 = scalar_select %p199_p1, %s1055_s29, %s201_s12  }
   0x9   : > { %p1148_p5 = por %p212_p2, %p211_p0  ;;  %p1152_p6 = por %p218_p4, %p217_p3 }
   0xa   : > { %p909_p7 = scmp.ge.s32.totalorder %s1059_s30, 1  ;;  %p264_p8 = scmp.lt.s32.totalorder %s1059_s30, 3 }
   0xc   : > { %p265_p9 = pnand %p909_p7, %p264_p8 }
   0xd   : > { %p297_p10 = scmp.lt.s32.totalorder (!%p265_p9), %s1131_s9, 1  ;;  %s1062_s21 = smov (!%p265_p9), 96  }
   0xe   : > { %268 = sbr.rel (%p265_p9) target bundleno = 1749 (0x6d5), region = 52  ;;  %s1063_s22 = smov (!%p265_p9), 64  }
   0xf   : > { %s294_s19 = sand.u32 (!%p265_p9), 1, %s1051_s28  }
  0x13   : > { %v306_v0 = vld [vmem:[%s1405_s1 + $0x18] sm:$0xff]  ;;  %v305_v1 = vld [vmem:[%s1405_s1 + $0x10] sm:$0xff]  ;;  %v304_v2 = vld [vmem:[%s1405_s1 + $0x8] sm:$0xff]  ;;  %s298_s23 = scalar_select %p297_p10, %s1131_s9, 1  ;;  %vm307_vm0 = vcmask 261120   ;;  %vm405_vm1 = vcmask 64512  }
  0x14   : > { %323 = vmatpush.msra.mxu1 %v306_v0  ;;  %v358_v3 = vld [vmem:[%s1407_s3 + $0x18] sm:$0xff]  ;;  %v357_v4 = vld [vmem:[%s1407_s3 + $0x10] sm:$0xff]  ;;  %v303_v5 = vld [vmem:[%s1405_s1] sm:$0xff]  ;;  %vm517_vm2 = vcmask 523520   ;;  %vm591_vm3 = vcmask 785920   ;;  %vm665_vm4 = vcmask 1048320  }
  0x15   : > { %371 = vmatpush.msra.mxu3 %v358_v3  ;;  %s911_s17 = sshll.u32 %s298_s23, 3  ;;  %v334_v7 = vld [vmem:[%s1406_s2 + $0x18] sm:$0xff]  ;;  %v333_v8 = vld [vmem:[%s1406_s2 + $0x10] sm:$0xff]  ;;  %v332_v9 = vld [vmem:[%s1406_s2 + $0x8] sm:$0xff] }
  0x16   : > { %324 = vmatpush.msra.mxu1 %v305_v1  ;;  %s300_s20 = scalar_lea.vmem %s1404_s0, %s911_s17  ;;  %v331_v10 = vld [vmem:[%s1406_s2] sm:$0xff]  ;;  %v356_v11 = vld [vmem:[%s1407_s3 + $0x8] sm:$0xff] }
  0x17   : > { %372 = vmatpush.msra.mxu3 %v357_v4  ;;  %v1181_v6 = vld [vmem:[%s300_s20] sm:$0xff]  ;;  %s1061_s20 = smov 32  }
  0x18   : > { %325 = vmatpush.msra.mxu1 %v304_v2  ;;  %v355_v12 = vld [vmem:[%s1407_s3] sm:$0xff] }
  0x19   : > { %373 = vmatpush.msra.mxu3 %v356_v11 }
  0x1a   : > { %326 = vmatpush.msra.mxu1 %v303_v5 }
  0x1b   : > { %912 = vmatmul.msk.f32.vlgmr.msra.gmra.mxu1 %vm307_vm0, %v1181_v6  ;;  %374 = vmatpush.msra.mxu3 %v355_v12 }
  0x1c   : > { %347 = vmatpush.msrb.mxu1 %v334_v7  ;;  %914 = vmatmul.msk.f32.vlgmr.msra.gmra.mxu3 %vm307_vm0, %v1181_v6 }
  0x1e   : > { %348 = vmatpush.msrb.mxu1 %v333_v8 }
  0x20   : > { %349 = vmatpush.msrb.mxu1 %v332_v9 }
  0x22   : > { %350 = vmatpush.msrb.mxu1 %v331_v10 }
  0x23   : > { %913 = vmatmul.msk.f32.vlgmr.msrb.gmra.mxu1 %vm307_vm0, %v1181_v6 }
  0x98   : > { %v328_v13 = vpop.f32.mrf.mxu1 }
  0x9f   : > { %v376_v16 = vpop.f32.mrf.mxu3 }
  0xa0   : > { %v352_v14 = vpop.f32.mrf.mxu1 }
  0xa1   : > { %595 = vrot.lane.b32.xlu2 %v352_v14, %s1061_s20  ;;  %446 = vrot.lane.b32.xlu1 %v352_v14, %s1062_s21 }
  0xa2   : > { %521 = vrot.lane.b32.xlu0 %v352_v14, %s1063_s22  ;;  %915 = vmatpush.xpose.msk.msrb.mxu3 %vm307_vm0, %v352_v14 }
  0xa5   : > { %916 = vmatmul.msk.f32.vlgmr.msrb.gmra.mxu3 %vm307_vm0, %v328_v13 }
  0xa6   : > { %437 = vmatpush.msra.mxu3 %v376_v16 }
  0xa9   : > { %593 = vrot.lane.b32.xlu2 %v328_v13, %s1061_s20  ;;  %444 = vrot.lane.b32.xlu1 %v328_v13, %s1062_s21 }
  0xaa   : > { %519 = vrot.lane.b32.xlu0 %v328_v13, %s1063_s22 }
  0xfb   : > { %v596_v15 = vpop.permute.xlu2 %595 }
  0xfc   : > { %924 = vmatpush.xpose.msk.msra.mxu0 %vm307_vm0, %v596_v15 }
 0x103   : > { %v594_v17 = vpop.permute.xlu2 %593 }
 0x104   : > { %925 = vmatmul.msk.f32.vlgmr.msra.gmra.mxu0 %vm307_vm0, %v594_v17 }
 0x113   : > { %v447_v18 = vpop.permute.xlu1 %446 }
 0x114   : > { %v522_v19 = vpop.permute.xlu0 %521  ;;  %918 = vmatpush.xpose.msk.msra.mxu1 %vm307_vm0, %v447_v18  ;;  %v683_v18 = vld [vmem:[%s1408_s4 + $0x78] sm:$0xff] }
 0x115   : > { %921 = vmatpush.xpose.msk.msra.mxu2 %vm307_vm0, %v522_v19  ;;  %v682_v19 = vld [vmem:[%s1408_s4 + $0x70] sm:$0xff] }
 0x119   : > { %684 = vmatpush.msrb.mxu2 %v683_v18 }
 0x11b   : > { %v445_v20 = vpop.permute.xlu1 %444  ;;  %685 = vmatpush.msrb.mxu2 %v682_v19 }
 0x11c   : > { %v520_v21 = vpop.permute.xlu0 %519  ;;  %919 = vmatmul.msk.f32.vlgmr.msra.gmra.mxu1 %vm307_vm0, %v445_v20  ;;  %v681_v20 = vld [vmem:[%s1408_s4 + $0x68] sm:$0xff] }
 0x11d   : > { %922 = vmatmul.msk.f32.vlgmr.msra.gmra.mxu2 %vm307_vm0, %v520_v21  ;;  %v680_v21 = vld [vmem:[%s1408_s4 + $0x60] sm:$0xff] }
 0x11e   : > { %686 = vmatpush.msrb.mxu2 %v681_v20 }
 0x120   : > { %687 = vmatpush.msrb.mxu2 %v680_v21 }
 0x128   : > { %v402_v22 = vpop.f32.mrf.mxu3 }
 0x129   : > { %v406_v23 = vsel %vm405_vm1, %v402_v22, -inf }
 0x12a   : > { %407 = vmax.xlane.f32.xlu0 %v406_v23  ;;  %v678_v23 = vld [vmem:[%s1408_s4 + $0x50] sm:$0xff] }
 0x13e   : > { %486 = vrot.lane.b32.xlu0 %v376_v16, %s1062_s21 }
 0x181   : > { %v618_v24 = vpop.f32.mrf.mxu0 }
 0x182   : > { %v621_v25 = vsel %vm405_vm1, %v618_v24, -inf }
 0x183   : > { %622 = vmax.xlane.f32.xlu2 %v621_v25  ;;  %v676_v25 = vld [vmem:[%s1408_s4 + $0x40] sm:$0xff] }
 0x199   : > { %v469_v26 = vpop.f32.mrf.mxu1 }
 0x19a   : > { %v472_v27 = vsel %vm405_vm1, %v469_v26, -inf }
 0x19b   : > { %473 = vmax.xlane.f32.xlu1 %v472_v27  ;;  %v674_v27 = vld [vmem:[%s1408_s4 + $0x30] sm:$0xff] }
 0x19d   : > { %v408_v28 = vpop.xlane.xlu0 %407 }
 0x19e   : > { %v409_v29 = vsub.f32 %v402_v22, %v408_v28  ;;  %v679_v22 = vld [vmem:[%s1408_s4 + $0x58] sm:$0xff]  ;;  %v673_v28 = vld [vmem:[%s1408_s4 + $0x28] sm:$0xff] }
 0x19f   : > { %688 = vmatpush.msrb.mxu2 %v679_v22  ;;  %v768_v22 = vld [vmem:[%s1410_s6 + $0x10] sm:$0xff] }
 0x1a0   : > { %v410_v30 = vmul.f32 1.442695, %v409_v29  ;;  %v544_v31 = vpop.f32.mrf.mxu2  ;;  %v672_v29 = vld [vmem:[%s1408_s4 + $0x20] sm:$0xff] }
 0x1a1   : > { %v547_v32 = vsel %vm405_vm1, %v544_v31, -inf  ;;  %689 = vmatpush.msrb.mxu2 %v678_v23  ;;  %v767_v23 = vld [vmem:[%s1410_s6 + $0x8] sm:$0xff] }
 0x1a2   : > { %975 = vpow2.f32 %v410_v30  ;;  %548 = vmax.xlane.f32.xlu2 %v547_v32  ;;  %v671_v30 = vld [vmem:[%s1408_s4 + $0x18] sm:$0xff]  ;;  %v669_v32 = vld [vmem:[%s1408_s4 + $0x8] sm:$0xff] }
 0x1a8   : > { %v976_v33 = vpop.eup %975 }
 0x1a9   : > { %917 = vmatmul.msk.f32.vlgmr.msra.gmra.mxu3 %vm405_vm1, %v976_v33  ;;  %v412_v51 = vsel %vm405_vm1, %v976_v33, 0.0  ;;  %v668_v33 = vld [vmem:[%s1408_s4] sm:$0xff] }
 0x1b0   : > { %v487_v34 = vpop.permute.xlu0 %486 }
 0x1b1   : > { %507 = vmatpush.msrb.mxu1 %v487_v34 }
 0x1b4   : > { %560 = vrot.lane.b32.xlu1 %v376_v16, %s1063_s22 }
 0x1ba   : > { %634 = vrot.lane.b32.xlu2 %v376_v16, %s1061_s20 }
 0x1f6   : > { %v623_v35 = vpop.xlane.xlu2 %622 }
 0x1f7   : > { %v624_v36 = vsub.f32 %v618_v24, %v623_v35  ;;  %v677_v24 = vld [vmem:[%s1408_s4 + $0x48] sm:$0xff] }
 0x1f8   : > { %690 = vmatpush.msrb.mxu2 %v677_v24  ;;  %v766_v24 = vld [vmem:[%s1410_s6] sm:$0xff] }
 0x1f9   : > { %v625_v37 = vmul.f32 1.442695, %v624_v36 }
 0x1fa   : > { %691 = vmatpush.msrb.mxu2 %v676_v25 }
 0x1fb   : > { %977 = vpow2.f32 %v625_v37 }
 0x201   : > { %v978_v38 = vpop.eup %977 }
 0x202   : > { %v627_v39 = vsel %vm405_vm1, %v978_v38, 0.0 }
 0x203   : > { %628 = vadd.xlane.f32.xlu2 %v627_v39 }
 0x20e   : > { %v474_v40 = vpop.xlane.xlu1 %473 }
 0x20f   : > { %v475_v41 = vsub.f32 %v469_v26, %v474_v40  ;;  %v675_v26 = vld [vmem:[%s1408_s4 + $0x38] sm:$0xff] }
 0x210   : > { %692 = vmatpush.msrb.mxu2 %v675_v26 }
 0x211   : > { %v476_v42 = vmul.f32 1.442695, %v475_v41  ;;  %v1064_v41 = vmov 32.0  }
 0x212   : > { %693 = vmatpush.msrb.mxu2 %v674_v27 }
 0x213   : > { %979 = vpow2.f32 %v476_v42 }
 0x214   : > { %694 = vmatpush.msrb.mxu2 %v673_v28 }
 0x215   : > { %v549_v43 = vpop.xlane.xlu2 %548 }
 0x216   : > { %v550_v44 = vsub.f32 %v544_v31, %v549_v43  ;;  %695 = vmatpush.msrb.mxu2 %v672_v29  ;;  %v670_v31 = vld [vmem:[%s1408_s4 + $0x10] sm:$0xff] }
 0x218   : > { %v551_v45 = vmul.f32 1.442695, %v550_v44  ;;  %696 = vmatpush.msrb.mxu2 %v671_v30 }
 0x219   : > { %v980_v46 = vpop.eup %979 }
 0x21a   : > { %981 = vpow2.f32 %v551_v45  ;;  %920 = vmatmul.msk.f32.vlgmr.msrb.gmra.mxu1 %vm405_vm1, %v980_v46  ;;  %v478_v47 = vsel %vm405_vm1, %v980_v46, 0.0  ;;  %697 = vmatpush.msrb.mxu2 %v670_v31 }
 0x21b   : > { %479 = vadd.xlane.f32.xlu0 %v478_v47 }
 0x21c   : > { %698 = vmatpush.msrb.mxu2 %v669_v32 }
 0x21d   : > { %v635_v48 = vpop.permute.xlu2 %634 }
 0x21e   : > { %655 = vmatpush.msra.mxu1 %v635_v48  ;;  %699 = vmatpush.msrb.mxu2 %v668_v33 }
 0x220   : > { %v982_v49 = vpop.eup %981 }
 0x221   : > { %v553_v50 = vsel %vm405_vm1, %v982_v49, 0.0 }
 0x222   : > { %554 = vadd.xlane.f32.xlu1 %v553_v50  ;;  %926 = vmatmul.msk.f32.vlgmr.msra.gmra.mxu1 %vm405_vm1, %v978_v38 }
 0x223   : > { %413 = vadd.xlane.f32.xlu0 %v412_v51 }
 0x226   : > { %v561_v52 = vpop.permute.xlu1 %560 }
 0x227   : > { %581 = vmatpush.msrb.mxu3 %v561_v52  ;;  %v740_v52 = vld [vmem:[%s1409_s5 + $0x18] sm:$0xff] }
 0x228   : > { %923 = vmatmul.msk.f32.vlgmr.msrb.gmra.mxu3 %vm405_vm1, %v982_v49 }
 0x229   : > { %757 = vmatpush.msra.mxu3 %v740_v52 }
 0x22c   : > { %v439_v12 = vpop.f32.mrf.mxu3 }
 0x276   : > { %v629_v53 = vpop.xlane.xlu2 %628 }
 0x277   : > { %983 = vrcp.f32 %v629_v53 }
 0x27d   : > { %v984_v55 = vpop.eup %983 }
 0x27e   : > { %v631_v57 = vmul.f32 %v984_v55, %v629_v53  ;;  %v739_v53 = vld [vmem:[%s1409_s5 + $0x10] sm:$0xff] }
 0x27f   : > { %758 = vmatpush.msra.mxu3 %v739_v53 }
 0x280   : > { %v632_v63 = vsub.f32 2.0, %v631_v57  ;;  %v780_v57 = vld [vmem:[%s1410_s6 + $0x70] sm:$0xff] }
 0x282   : > { %v633_v4 = vmul.f32 %v984_v55, %v632_v63  ;;  %v737_v55 = vld [vmem:[%s1409_s5] sm:$0xff]  ;;  %v777_v63 = vld [vmem:[%s1410_s6 + $0x58] sm:$0xff] }
 0x28e   : > { %v480_v54 = vpop.xlane.xlu0 %479 }
 0x28f   : > { %985 = vrcp.f32 %v480_v54 }
 0x295   : > { %v986_v56 = vpop.eup %985  ;;  %v555_v59 = vpop.xlane.xlu1 %554 }
 0x296   : > { %v482_v58 = vmul.f32 %v986_v56, %v480_v54  ;;  %v414_v60 = vpop.xlane.xlu0 %413  ;;  %v738_v54 = vld [vmem:[%s1409_s5 + $0x8] sm:$0xff] }
 0x297   : > { %987 = vrcp.f32 %v414_v60  ;;  %v509_v61 = vpop.f32.mrf.mxu1  ;;  %759 = vmatpush.msra.mxu3 %v738_v54 }
 0x298   : > { %v483_v62 = vsub.f32 2.0, %v482_v58  ;;  %989 = vrcp.f32 %v555_v59  ;;  %v779_v58 = vld [vmem:[%s1410_s6 + $0x68] sm:$0xff] }
 0x299   : > { %991 = vrcp.f32 %v1064_v41  ;;  %760 = vmatpush.msra.mxu3 %v737_v55 }
 0x29a   : > { %v484_v0 = vmul.f32 %v986_v56, %v483_v62  ;;  %v781_v56 = vld [vmem:[%s1410_s6 + $0x78] sm:$0xff] }
 0x29b   : > { %783 = vmatpush.msrb.mxu0 %v781_v56 }
 0x29c   : > { %v512_v1 = vmul.f32 %v509_v61, %v484_v0  ;;  %v778_v61 = vld [vmem:[%s1410_s6 + $0x60] sm:$0xff]  ;;  %v776_v0 = vld [vmem:[%s1410_s6 + $0x50] sm:$0xff] }
 0x29d   : > { %v988_v2 = vpop.eup %987  ;;  %784 = vmatpush.msrb.mxu0 %v780_v57 }
 0x29e   : > { %v416_v3 = vmul.f32 %v988_v2, %v414_v60  ;;  %514 = vrot.lane.b32.xlu1 %v512_v1, %s1061_s20  ;;  %v990_v5 = vpop.eup %989  ;;  %v775_v1 = vld [vmem:[%s1410_s6 + $0x48] sm:$0xff]  ;;  %s910_s20 = sshll.u32 %s294_s19, 3 }
 0x29f   : > { %v657_v7 = vpop.f32.mrf.mxu1  ;;  %v557_v10 = vmul.f32 %v990_v5, %v555_v59  ;;  %v992_v42 = vpop.eup %991  ;;  %785 = vmatpush.msrb.mxu0 %v779_v58  ;;  %s296_s23 = scalar_lea.vmem [#allocation3], %s910_s20  ;;  %s1017_s20 = scalar_lea.hbm %s1412_s8, 16 }
 0x2a0   : > { %v417_v8 = vsub.f32 2.0, %v416_v3  ;;  %v660_v9 = vmul.f32 %v657_v7, %v633_v4  ;;  %v708_v43 = vmul.f32 32.0, %v992_v42  ;;  %vm712_vm5 = vweird.f32 %v992_v42  ;;  %v773_v4 = vld [vmem:[%s1410_s6 + $0x38] sm:$0xff]  ;;  %v772_v7 = vld [vmem:[%s1410_s6 + $0x30] sm:$0xff]  ;;  %s844_s26 = sshll.u32 %s296_s23, 4  ;;  %s845_s26 = int_to_ptr.vmem [resolvable:$true] %s844_s26 }
 0x2a1   : > { %v558_v14 = vsub.f32 2.0, %v557_v10  ;;  %786 = vmatpush.msrb.mxu0 %v778_v61 }
 0x2a2   : > { %v418_v11 = vmul.f32 %v988_v2, %v417_v8  ;;  %662 = vrot.lane.b32.xlu2 %v660_v9, %s1062_s21  ;;  %v709_v44 = vsub.f32 1.0, %v708_v43  ;;  %v774_v2 = vld [vmem:[%s1410_s6 + $0x40] sm:$0xff]  ;;  %v771_v9 = vld [vmem:[%s1410_s6 + $0x28] sm:$0xff]  ;;  %s929_s21 = sshll.u32 %s1131_s9, 3  ;;  %s832_s9 = scalar_lea.sflag [#allocation4], %s294_s19 }
 0x2a3   : > { %v559_v15 = vmul.f32 %v990_v5, %v558_v14  ;;  %787 = vmatpush.msrb.mxu0 %v777_v63  ;;  %v769_v14 = vld [vmem:[%s1410_s6 + $0x18] sm:$0xff]  ;;  %s842_s25 = scalar_lea.hbm %s1412_s8, %s929_s21 }
 0x2a4   : > { %v442_v13 = vmul.f32 %v439_v12, %v418_v11  ;;  %v710_v45 = vmul.f32 %v992_v42, %v709_v44  ;;  %v770_v11 = vld [vmem:[%s1410_s6 + $0x20] sm:$0xff]  ;;  %s846_s10 = sshll.u32 %s842_s25, 4  ;;  %s847_s10 = int_to_ptr.hbm [resolvable:$true] %s846_s10 }
 0x2a5   : > { %788 = vmatpush.msrb.mxu0 %v776_v0  ;;  %v1346_v12 = vld [vmem:[%s1411_s7] sm:$0xff]  ;;  %s1011_s12 = sshra.s32 %s847_s10, 4  ;;  %s1012_s12 = int_to_ptr.hbm [resolvable:$true] %s1011_s12 }
 0x2a6   : > { %443 = vst.msk [vmem:[#allocation2] sm:$0xff] %vm307_vm0, %v442_v13  ;;  %v711_v46 = vadd.f32 %v992_v42, %v710_v45  ;;  %v735_v19 = vperm.slane %v1346_v12, 1  ;;  %v741_v25 = vperm.slane %v1346_v12, 2  ;;  %v782_v29 = vperm.slane %v1346_v12, 3  ;;  %s1013_s13 = scalar_lea.hbm %s1012_s12, 8  ;;  %p1018_p0 = scmp.lt.s32.totalorder %s1012_s12, %s1412_s8 }
 0x2a7   : > { %789 = vmatpush.msrb.mxu0 %v775_v1  ;;  %p1014_p11 = scmp.ne.s32.totalorder %s1012_s12, %s1013_s13  ;;  %p1019_p1 = scmp.lt.s32.totalorder %s1017_s20, %s1013_s13 }
 0x2a8   : > { %v1290_v47 = vsel %vm712_vm5, %v992_v42, %v711_v46 }
 0x2a9   : > { %790 = vmatpush.msrb.mxu0 %v774_v2  ;;  %p1015_p12 = pnand %p1014_p11, %p1148_p5  ;;  %p1020_p2 = por %p1019_p1, %p1018_p0 }
 0x2ab   : > { %v583_v16 = vpop.f32.mrf.mxu3  ;;  %791 = vmatpush.msrb.mxu0 %v773_v4  ;;  %p1016_p13 = pneg %p1015_p12 }
 0x2ac   : > { %v586_v17 = vmul.f32 %v583_v16, %v559_v15  ;;  %v733_v16 = vperm.slane %v1346_v12, 0 }
 0x2ad   : > { %792 = vmatpush.msrb.mxu0 %v772_v7  ;;  %p1021_p3 = pnand %p1020_p2, %p1016_p13 }
 0x2ae   : > { %588 = vrot.lane.b32.xlu0 %v586_v17, %s1063_s22 }
 0x2af   : > { %793 = vmatpush.msrb.mxu0 %v771_v9 }
 0x2b1   : > { %794 = vmatpush.msrb.mxu0 %v770_v11 }
 0x2b3   : > { %795 = vmatpush.msrb.mxu0 %v769_v14 }
 0x2b5   : > { %796 = vmatpush.msrb.mxu0 %v768_v22 }
 0x2b7   : > { %797 = vmatpush.msrb.mxu0 %v767_v23 }
 0x2b9   : > { %798 = vmatpush.msrb.mxu0 %v766_v24 }
 0x2fc   : > { %v663_v36 = vpop.permute.xlu2 %662 }
 0x310   : > { %v515_v34 = vpop.permute.xlu1 %514 }
 0x311   : > { %518 = vst.msk [vmem:[#allocation2] sm:$0xff] %vm517_vm2, %v515_v34 }
 0x320   : > { %v589_v35 = vpop.permute.xlu0 %588 }
 0x321   : > { %592 = vst.msk [vmem:[#allocation2] sm:$0xff] %vm591_vm3, %v589_v35 }
 0x322   : > { %666 = vst.msk [vmem:[#allocation2] sm:$0xff] %vm665_vm4, %v663_v36 }
 0x329   : > { %v667_v37 = vld [vmem:[#allocation2] sm:$0xff] }
 0x32a   : > { %700 = vmatmul.f32.vlgmr.msrb.gmra.mxu2 %v667_v37 }
 0x3ad   : > { %v701_v38 = vpop.f32.mrf.mxu2 }
 0x3ae   : > { %v702_v39 = vadd.f32 %v701_v38, %v1181_v6 }
 0x3b0   : > { %v704_v40 = vsel %vm307_vm0, %v702_v39, 0.0 }
 0x3b1   : > { %705 = vadd.xlane.f32.xlu0 %v704_v40 }
 0x424   : > { %v706_v48 = vpop.xlane.xlu0 %705 }
 0x425   : > { %v714_v49 = vmul.f32 %v1290_v47, %v706_v48 }
 0x427   : > { %v715_v50 = vsub.f32 %v702_v39, %v714_v49  ;;  %v826_v49 = vperm.slane %v1346_v12, 4 }
 0x429   : > { %v716_v51 = vmul.f32 %v715_v50, %v715_v50 }
 0x42b   : > { %v717_v6 = vsel %vm307_vm0, %v716_v51, 0.0  ;;  %v828_v51 = vperm.slane %v1346_v12, 5 }
 0x42c   : > { %718 = vadd.xlane.f32.xlu1 %v717_v6 }
 0x49f   : > { %v719_v59 = vpop.xlane.xlu1 %718 }
 0x4a0   : > { %v720_v60 = vmul.f32 %v719_v59, %v1290_v47 }
 0x4a2   : > { %v721_v62 = vadd.f32 1e-05, %v720_v60 }
 0x4a4   : > { %993 = vrsqrt.f32 %v721_v62  ;;  %vm728_vm7 = vweird.f32 %v721_v62 }
 0x4aa   : > { %v994_v3 = vpop.eup %993 }
 0x4ab   : > { %v723_v5 = vmul.f32 %v994_v3, %v721_v62  ;;  %vm729_vm6 = vweird.f32 %v994_v3 }
 0x4ac   : > { %vm730_vm8 = vmor %vm728_vm7, %vm729_vm6 }
 0x4ad   : > { %v724_v8 = vmul.f32 %v994_v3, %v723_v5 }
 0x4af   : > { %v725_v10 = vmul.f32 0.5, %v724_v8 }
 0x4b1   : > { %v726_v13 = vsub.f32 1.5, %v725_v10 }
 0x4b3   : > { %v727_v15 = vmul.f32 %v994_v3, %v726_v13 }
 0x4b5   : > { %v731_v17 = vsel %vm730_vm8, %v994_v3, %v727_v15 }
 0x4b6   : > { %v732_v18 = vmul.f32 %v731_v17, %v715_v50 }
 0x4b8   : > { %v734_v20 = vmul.f32 %v733_v16, %v732_v18 }
 0x4ba   : > { %v736_v21 = vadd.f32 %v735_v19, %v734_v20 }
 0x4bc   : > { %927 = vmatmul.msk.f32.vlgmr.msra.gmra.mxu3 %vm307_vm0, %v736_v21 }
 0x53f   : > { %v762_v26 = vpop.f32.mrf.mxu3 }
 0x540   : > { %v763_v27 = vadd.f32 %v762_v26, %v741_v25 }
 0x542   : > { %v765_v28 = vmax.f32 %v763_v27, 0.0 }
 0x544   : > { %799 = vmatmul.f32.vlgmr.msrb.gmra.mxu0 %v765_v28 }
 0x5c1   : > { %v800_v30 = vpop.f32.mrf.mxu0 }
 0x5c2   : > { %v801_v31 = vadd.f32 %v800_v30, %v782_v29 }
 0x5c4   : > { %v803_v32 = vadd.f32 %v801_v31, %v736_v21 }
 0x5c6   : > { %v804_v33 = vsel %vm307_vm0, %v803_v32, 0.0 }
 0x5c7   : > { %805 = vadd.xlane.f32.xlu2 %v804_v33 }
 0x63a   : > { %v806_v34 = vpop.xlane.xlu2 %805 }
 0x63b   : > { %v807_v35 = vmul.f32 %v806_v34, %v1290_v47 }
 0x63d   : > { %v808_v36 = vsub.f32 %v803_v32, %v807_v35 }
 0x63f   : > { %v809_v37 = vmul.f32 %v808_v36, %v808_v36 }
 0x641   : > { %v810_v38 = vsel %vm307_vm0, %v809_v37, 0.0 }
 0x642   : > { %811 = vadd.xlane.f32.xlu0 %v810_v38 }
 0x6b5   : > { %v812_v39 = vpop.xlane.xlu0 %811 }
 0x6b6   : > { %v813_v40 = vmul.f32 %v812_v39, %v1290_v47 }
 0x6b8   : > { %v814_v41 = vadd.f32 1e-05, %v813_v40 }
 0x6ba   : > { %995 = vrsqrt.f32 %v814_v41  ;;  %vm821_vm10 = vweird.f32 %v814_v41 }
 0x6c0   : > { %v996_v42 = vpop.eup %995 }
 0x6c1   : > { %v816_v43 = vmul.f32 %v996_v42, %v814_v41  ;;  %vm822_vm9 = vweird.f32 %v996_v42 }
 0x6c2   : > { %vm823_vm11 = vmor %vm821_vm10, %vm822_vm9 }
 0x6c3   : > { %v817_v44 = vmul.f32 %v996_v42, %v816_v43 }
 0x6c5   : > { %v818_v45 = vmul.f32 0.5, %v817_v44 }
 0x6c7   : > { %v819_v46 = vsub.f32 1.5, %v818_v45 }
 0x6c9   : > { %v820_v48 = vmul.f32 %v996_v42, %v819_v46 }
 0x6cb   : > { %v824_v47 = vsel %vm823_vm11, %v996_v42, %v820_v48 }
 0x6cc   : > { %v825_v50 = vmul.f32 %v824_v47, %v808_v36 }
 0x6ce   : > { %v827_v6 = vmul.f32 %v826_v49, %v825_v50 }
 0x6d0   : > { %v829_v52 = vadd.f32 %v828_v51, %v827_v6 }
 0x6d2   : > { %830 = vst.msk [vmem:[%s296_s23] sm:$0xff] %vm307_vm0, %v829_v52 }
 0x6d3   : > { %1024 = shalt.err (!%p1021_p3)
}
 0x6d4   : > { %932 = dma.vmem_to_hbm [thread:$0]  (%p1148_p5), %s845_s26, 128, %s847_s10, %s832_s9  }
 0x6d5 PF: > { %p938_p4 = scmp.ge.s32.totalorder %s1059_s30, 2  ;;  %s858_s19 = sand.u32 1, %s1047_s27  }
 0x6d6   : > { %s859_s24 = scalar_lea.sflag [#allocation4], %s858_s19 }
 0x6d7   : > { %p935_p7 = pnand %p938_p4, %p1152_p6 }
 0x6d9   : > { %p936_p8 = pneg %p935_p7 }
 0x6db   : > { %1042 = dma.done.wait (%p936_p8), %s859_s24, 128  }
 0x6dc   : > { %1044 = vsyncadd (%p936_p8), %s859_s24, 4294967168  ;;  %p18_p9 = scmp.ge.s32.totalorder %s1135_s11, 4   ;;  %s1415_s27 = smov %s1051_s28 }
 0x6dd   : > { %s1416_s28 = smov %s1055_s29  ;;  %s1417_s29 = smov %s1146_s14 }
 0x6de   : > { %s1418_s30 = smov %s1135_s11  ;;  %20 = sbr.rel (!%p18_p9) target bundleno = 3 (0x3), region = 87 }
 0x6e3   :  { %865 = vsyncpa [#allocation4], 1 }
 0x6e4   :  { %867 = vsyncpa [#allocation4 + $0x1], 1 }

</bundles_post_ra>
